<compile_context>
chip_gen: v7x
topology: tpu7x:2x2x1
jax: 0.10.0
libtpu: 0.0.40
codegen_flags: <defaults>
</compile_context>

<pallas_src>
import functools

import jax
import jax.numpy as jnp
from jax.experimental import pallas as pl
from jax.experimental.pallas import tpu as pltpu


def _attention_kernel(*refs, num_head, key_dim, value_dim, out_dim,
                      block_b, block_q, num_k, has_nb):
    if has_nb:
        (qd_ref, md_ref, bias_ref, nb_ref,
         qw_ref, kw_ref, vw_ref, gw_ref, gb_ref, ow_ref, ob_ref,
         out_ref, q_scr, k_scr, v_scr) = refs
    else:
        (qd_ref, md_ref, bias_ref,
         qw_ref, kw_ref, vw_ref, gw_ref, gb_ref, ow_ref, ob_ref,
         out_ref, q_scr, k_scr, v_scr) = refs
        nb_ref = None

    Bb, Qt, K = block_b, block_q, num_k
    H, Ck, Cv = num_head, key_dim, value_dim
    A = qd_ref.shape[-1]
    M = md_ref.shape[-1]

    # k/v projections depend only on the batch tile -> compute them once per
    # batch tile (first Q step) and keep them resident in bf16 VMEM scratch.
    @pl.when(pl.program_id(1) == 0)
    def _project_kv():
        md = md_ref[...].reshape(Bb * K, M)                                   # bf16
        k = jnp.dot(md, kw_ref[...], preferred_element_type=jnp.float32)      # (Bb*K, H*Ck)
        v = jnp.dot(md, vw_ref[...], preferred_element_type=jnp.float32)      # (Bb*K, H*Cv)
        k_scr[...] = k.astype(jnp.bfloat16).reshape(Bb, K, H * Ck)
        v_scr[...] = v.astype(jnp.bfloat16).reshape(Bb, K, H * Cv)

    # q projection for this (batch, Q) tile; 1/sqrt(Ck) already folded into qw.
    qd = qd_ref[...].reshape(Bb * Qt, A)                                      # bf16
    q = jnp.dot(qd, qw_ref[...], preferred_element_type=jnp.float32)          # (Bb*Qt, H*Ck)
    q_scr[...] = q.astype(jnp.bfloat16).reshape(Bb, Qt, H * Ck)

    # Bias sum hoisted out of the head loop; streamed bf16, added in f32.
    bias_total = bias_ref[...].astype(jnp.float32)                            # (Bb, Qt, K)
    if has_nb:
        bias_total = bias_total + nb_ref[...].astype(jnp.float32)             # broadcast over Bb

    # Per-head attention.  Operands are re-read per head from VMEM scratch
    # (bounds vreg live ranges); results are gathered in registers and
    # concatenated once into a lane-dense (Bb*Qt, H*Cv) slab -- no masked
    # per-head partial stores, no f32 scratch round-trip.
    wa_heads = []
    for h in range(H):  # H is small and static; unrolled
        qh = q_scr[:, :, h * Ck:(h + 1) * Ck]                                 # (Bb, Qt, Ck) bf16
        kh = k_scr[:, :, h * Ck:(h + 1) * Ck]                                 # (Bb, K, Ck)  bf16
        vh = v_scr[:, :, h * Cv:(h + 1) * Cv]                                 # (Bb, K, Cv)  bf16

        # Contract the last dims directly -- no explicit K transpose.
        logits = jnp.einsum('bqc,bkc->bqk', qh, kh,
                            preferred_element_type=jnp.float32) + bias_total  # (Bb, Qt, K)
        logits = logits - jnp.max(logits, axis=-1, keepdims=True)
        p = jnp.exp(logits)
        inv_den = pl.reciprocal(jnp.sum(p, axis=-1, keepdims=True), approx=True)
        w = (p * inv_den).astype(jnp.bfloat16)

        wa_heads.append(jnp.einsum('bqk,bkc->bqc', w, vh,
                                   preferred_element_type=jnp.float32))       # (Bb, Qt, Cv)

    wa = jnp.concatenate(wa_heads, axis=-1).reshape(Bb * Qt, H * Cv)          # f32

    # Gating projection after the head loop (keeps its live range short).
    gate = jax.nn.sigmoid(
        jnp.dot(qd_ref[...].reshape(Bb * Qt, A), gw_ref[...],
                preferred_element_type=jnp.float32) + gb_ref[...])            # (Bb*Qt, H*Cv)

    # Single gated output projection: (Bb*Qt, H*Cv) @ (H*Cv, O).
    gated = (wa * gate).astype(jnp.bfloat16)
    out = jnp.dot(gated, ow_ref[...], preferred_element_type=jnp.float32) + ob_ref[...]
    out_ref[...] = out.reshape(Bb, Qt, out_dim).astype(out_ref.dtype)


def _vmem_capacity_bytes():
    """Physical VMEM per core (128 MiB v5e/v6e, 64 MiB v7x); safe fallback."""
    default = 64 * 1024 * 1024
    try:
        info = pltpu.get_tpu_info()
        cap = getattr(info, "vmem_capacity_bytes", None)
        return int(cap) if cap else default
    except Exception:
        return default


def _pick_blocks(B, Q, K, A, M, H, Ck, Cv, O, out_itemsize, has_nb, budget_bytes):
    """Largest (block_b, block_q) whose per-step working set fits the budget,
    preferring configurations with >=2 grid steps (pipelining + megacore)."""
    bf16 = 2
    # Grid-invariant weights (default double-buffered) + f32 biases.
    fixed = 2 * bf16 * (A * H * Ck + M * H * Ck + M * H * Cv + A * H * Cv + H * Cv * O)
    fixed += 2 * 4 * (H * Cv + O)

    def step_bytes(bb, bq):
        dbl = 2  # pipeline double-buffering of grid-varying blocks
        blocks = dbl * (bb * bq * A * bf16          # q_data tile
                        + bb * K * M * bf16         # m_data tile
                        + bb * bq * K * bf16        # bias tile
                        + bb * bq * O * out_itemsize)
        if has_nb:
            blocks += dbl * bq * K * bf16
        scratch = bb * bq * H * Ck * bf16 + bb * K * (H * Ck + H * Cv) * bf16
        # Rough allowance for f32 intermediates (logits/p, wa, gate, k/v proj).
        live = 4 * (2 * bb * bq * K + 2 * bb * bq * H * Cv + bb * bq * H * Ck
                    + bb * K * (H * Ck + H * Cv))
        return fixed + blocks + scratch + live

    bb_cands = sorted([d for d in range(1, B + 1) if B % d == 0], reverse=True)
    bq_cands = sorted([d for d in range(1, Q + 1)
                       if Q % d == 0 and d <= 512 and (d % 8 == 0 or d == Q)],
                      reverse=True)
    if not bq_cands:
        bq_cands = [Q]

    fitting = [(bb, bq) for bb in bb_cands for bq in bq_cands
               if step_bytes(bb, bq) <= budget_bytes]
    if not fitting:
        fitting = [(1, min(bq_cands))]  # smallest config; let the compiler try

    def score(cfg):
        bb, bq = cfg
        steps = (B // bb) * (Q // bq)
        return (1 if steps >= 2 else 0, bb * bq)

    return max(fitting, key=score)


def attention_pallas(q_data, m_data, bias, nonbatched_bias, params,
                     num_head, key_dim, value_dim, output_dim,
                     block_b=None, block_q=None):
    B, Q, A = q_data.shape
    _, K, M = m_data.shape
    H, Ck, Cv, O = num_head, key_dim, value_dim, output_dim
    has_nb = nonbatched_bias is not None

    cdt = jnp.bfloat16  # MXU-native operand dtype on v5e/v6e/v7x

    # Per-generation VMEM budget derived from the chip (not hard-coded).
    vmem_cap = _vmem_capacity_bytes()
    vmem_limit = int(0.75 * vmem_cap)          # ~96 MiB v5e/v6e, ~48 MiB v7x
    budget = int(0.80 * vmem_limit)            # headroom for spills/pipeline

    auto_bb, auto_bq = _pick_blocks(B, Q, K, A, M, H, Ck, Cv, O,
                                    q_data.dtype.itemsize, has_nb, budget)
    block_b = auto_bb if block_b is None else block_b
    block_q = auto_bq if block_q is None else block_q
    assert B % block_b == 0 and Q % block_q == 0

    # Fold 1/sqrt(key_dim) into q_weights at parameter-prep time.
    scale = Ck ** (-0.5)
    qw = (params["q_weights"].reshape(A, H * Ck).astype(jnp.float32) * scale).astype(cdt)
    kw = params["k_weights"].reshape(M, H * Ck).astype(cdt)
    vw = params["v_weights"].reshape(M, H * Cv).astype(cdt)
    gw = params["gating_w"].reshape(A, H * Cv).astype(cdt)
    gb = params["gating_b"].reshape(1, H * Cv).astype(jnp.float32)
    ow = params["o_weights"].reshape(H * Cv, O).astype(cdt)
    ob = params["o_bias"].reshape(1, O).astype(jnp.float32)

    qd = q_data.astype(cdt)
    md = m_data.astype(cdt)
    # Stream bias as bf16 (largest per-step DMA); upcast inside the kernel.
    bias_lo = bias.astype(cdt)

    kernel = functools.partial(
        _attention_kernel,
        num_head=H, key_dim=Ck, value_dim=Cv, out_dim=O,
        block_b=block_b, block_q=block_q, num_k=K, has_nb=has_nb)

    in_specs = [
        pl.BlockSpec((block_b, block_q, A), lambda b, qt: (b, qt, 0)),  # q_data
        pl.BlockSpec((block_b, K, M), lambda b, qt: (b, 0, 0)),         # m_data (reused across qt)
        pl.BlockSpec((block_b, block_q, K), lambda b, qt: (b, qt, 0)),  # bias
    ]
    inputs = [qd, md, bias_lo]

    if has_nb:  # static branch: skip the DMA + add entirely when absent
        in_specs.append(pl.BlockSpec((block_q, K), lambda b, qt: (qt, 0)))
        inputs.append(nonbatched_bias.astype(cdt))

    # Grid-invariant weights: constant block index => DMA'd once, then reused.
    for w in (qw, kw, vw, gw, gb, ow, ob):
        in_specs.append(pl.BlockSpec(w.shape, lambda b, qt: (0, 0)))
        inputs.append(w)

    grid_spec = pltpu.PrefetchScalarGridSpec(
        num_scalar_prefetch=0,
        grid=(B // block_b, Q // block_q),
        in_specs=in_specs,
        out_specs=pl.BlockSpec((block_b, block_q, O), lambda b, qt: (b, qt, 0)),
        scratch_shapes=[
            pltpu.VMEM((block_b, block_q, H * Ck), cdt),   # q  (per Q tile)
            pltpu.VMEM((block_b, K, H * Ck), cdt),         # k  (per batch tile)
            pltpu.VMEM((block_b, K, H * Cv), cdt),         # v  (per batch tile)
        ],
    )

    return pl.pallas_call(
        kernel,
        out_shape=jax.ShapeDtypeStruct((B, Q, O), q_data.dtype),
        grid_spec=grid_spec,
        compiler_params=pltpu.CompilerParams(
            dimension_semantics=("parallel", "arbitrary"),
            vmem_limit_bytes=vmem_limit,
        ),
    )(*inputs)


def attention_reference(q_data, m_data, bias, nonbatched_bias, params, key_dim):
    q = jnp.einsum('bqa,ahc->bqhc', q_data, params["q_weights"]) * key_dim ** (-0.5)
    k = jnp.einsum('bka,ahc->bkhc', m_data, params["k_weights"])
    v = jnp.einsum('bka,ahc->bkhc', m_data, params["v_weights"])
    logits = jnp.einsum('bqhc,bkhc->bhqk', q, k) + bias[:, None, :, :]
    if nonbatched_bias is not None:
        logits = logits + nonbatched_bias[None, None, :, :]
    weights = jax.nn.softmax(logits, axis=-1)
    weighted_avg = jnp.einsum('bhqk,bkhc->bqhc', weights, v)
    gate = jax.nn.sigmoid(
        jnp.einsum('bqc,chv->bqhv', q_data, params["gating_w"]) + params["gating_b"])
    weighted_avg = weighted_avg * gate
    return jnp.einsum('bqhc,hco->bqo', weighted_avg, params["o_weights"]) + params["o_bias"]


if __name__ == "__main__":
    # Small shapes consistent with the module's forward.
    B, Q, K = 2, 8, 16
    num_head, key_dim, value_dim = 4, 8, 8      # per-head dims
    all_key_dim = num_head * key_dim            # 32
    all_value_dim = num_head * value_dim        # 32
    output_dim = 16

    key = jax.random.PRNGKey(0)
    ks = jax.random.split(key, 12)

    params = {
        "q_weights": jax.random.normal(ks[0], (all_key_dim, num_head, key_dim), jnp.float32) * 0.1,
        "k_weights": jax.random.normal(ks[1], (all_value_dim, num_head, key_dim), jnp.float32) * 0.1,
        "v_weights": jax.random.normal(ks[2], (all_value_dim, num_head, value_dim), jnp.float32) * 0.1,
        "o_weights": jax.random.normal(ks[3], (num_head, value_dim, output_dim), jnp.float32) * 0.1,
        "o_bias": jax.random.normal(ks[4], (output_dim,), jnp.float32) * 0.1,
        "gating_w": jax.random.normal(ks[5], (all_key_dim, num_head, value_dim), jnp.float32) * 0.1,
        "gating_b": jnp.ones((num_head, value_dim), jnp.float32),
    }

    q_data = jax.random.normal(ks[6], (B, Q, all_key_dim), jnp.float32)
    m_data = jax.random.normal(ks[7], (B, K, all_value_dim), jnp.float32)
    bias = jax.random.normal(ks[8], (B, Q, K), jnp.float32) * 0.5
    nonbatched_bias = jax.random.normal(ks[9], (Q, K), jnp.float32) * 0.5

    out = attention_pallas(q_data, m_data, bias, nonbatched_bias, params,
                           num_head, key_dim, value_dim, output_dim)
    out = jax.block_until_ready(out)

    ref = attention_reference(q_data, m_data, bias, nonbatched_bias, params, key_dim)
    assert out.shape == (B, Q, output_dim)
    # bf16 MXU operands + bf16-streamed bias + approx reciprocal => loosened tolerance.
    assert jnp.allclose(out, ref, atol=3e-2, rtol=3e-2), "mismatch vs reference"

    print("KERNEL_OK")
</pallas_src>

<mosaic_0001>
module attributes {stable_mosaic.version = 11 : i64} {
  func.func @_attention_kernel(%arg0: i32, %arg1: i32, %arg2: memref<1x8x32xbf16, #tpu.memory_space<vmem>>, %arg3: memref<1x16x32xbf16, #tpu.memory_space<vmem>>, %arg4: memref<1x8x16xbf16, #tpu.memory_space<vmem>>, %arg5: memref<8x16xbf16, #tpu.memory_space<vmem>>, %arg6: memref<32x32xbf16, #tpu.memory_space<vmem>>, %arg7: memref<32x32xbf16, #tpu.memory_space<vmem>>, %arg8: memref<32x32xbf16, #tpu.memory_space<vmem>>, %arg9: memref<32x32xbf16, #tpu.memory_space<vmem>>, %arg10: memref<1x32xf32, #tpu.memory_space<vmem>>, %arg11: memref<32x16xbf16, #tpu.memory_space<vmem>>, %arg12: memref<1x16xf32, #tpu.memory_space<vmem>>, %arg13: memref<1x8x16xf32, #tpu.memory_space<vmem>>, %arg14: memref<1x8x32xbf16, #tpu.memory_space<vmem>>, %arg15: memref<1x16x32xbf16, #tpu.memory_space<vmem>>, %arg16: memref<1x16x32xbf16, #tpu.memory_space<vmem>>) attributes {dimension_semantics = [#tpu.dimension_semantics<parallel>, #tpu.dimension_semantics<arbitrary>], iteration_bounds = array<i64: 2, 1>, scalar_prefetch = 0 : i64, scratch_operands = 3 : i64, tpu.core_type = #tpu.core_type<tc>, window_params = [{transform_indices = @transform_0, window_bounds = array<i64: 1, 8, 32>}, {transform_indices = @transform_1, window_bounds = array<i64: 1, 16, 32>}, {transform_indices = @transform_2, window_bounds = array<i64: 1, 8, 16>}, {transform_indices = @transform_3, window_bounds = array<i64: 8, 16>}, {pipeline_mode = #tpu.pipeline_mode<synchronous>, transform_indices = @transform_4, window_bounds = array<i64: 32, 32>}, {pipeline_mode = #tpu.pipeline_mode<synchronous>, transform_indices = @transform_5, window_bounds = array<i64: 32, 32>}, {pipeline_mode = #tpu.pipeline_mode<synchronous>, transform_indices = @transform_6, window_bounds = array<i64: 32, 32>}, {pipeline_mode = #tpu.pipeline_mode<synchronous>, transform_indices = @transform_7, window_bounds = array<i64: 32, 32>}, {pipeline_mode = #tpu.pipeline_mode<synchronous>, transform_indices = @transform_8, window_bounds = array<i64: 1, 32>}, {pipeline_mode = #tpu.pipeline_mode<synchronous>, transform_indices = @transform_9, window_bounds = array<i64: 32, 16>}, {pipeline_mode = #tpu.pipeline_mode<synchronous>, transform_indices = @transform_10, window_bounds = array<i64: 1, 16>}, {transform_indices = @transform_11, window_bounds = array<i64: 1, 8, 16>}]} {
    %c0_i32 = arith.constant 0 : i32
    %0 = arith.cmpi eq, %arg1, %c0_i32 : i32
    %1 = arith.extui %0 : i1 to i32
    %c0_i32_0 = arith.constant 0 : i32
    %2 = arith.cmpi ne, %1, %c0_i32_0 : i32
    scf.if %2 {
      %c0_79 = arith.constant 0 : index
      %c0_80 = arith.constant 0 : index
      %c0_81 = arith.constant 0 : index
      %107 = vector.load %arg3[%c0_79, %c0_80, %c0_81] : memref<1x16x32xbf16, #tpu.memory_space<vmem>>, vector<1x16x32xbf16>
      %108 = vector.shape_cast %107 : vector<1x16x32xbf16> to vector<16x32xbf16>
      %c0_82 = arith.constant 0 : index
      %c0_83 = arith.constant 0 : index
      %109 = vector.load %arg7[%c0_82, %c0_83] : memref<32x32xbf16, #tpu.memory_space<vmem>>, vector<32x32xbf16>
      %cst_84 = arith.constant dense<0.000000e+00> : vector<16x32xf32>
      %110 = tpu.matmul %108, %109, %cst_84 {dimension_numbers = #tpu.dot_dimension_numbers<[1], [0], [0], [1], [0, 0, 1, 1], [], []>} : vector<16x32xbf16>, vector<32x32xbf16>, vector<16x32xf32> -> vector<16x32xf32>
      %c0_85 = arith.constant 0 : index
      %c0_86 = arith.constant 0 : index
      %111 = vector.load %arg8[%c0_85, %c0_86] : memref<32x32xbf16, #tpu.memory_space<vmem>>, vector<32x32xbf16>
      %cst_87 = arith.constant dense<0.000000e+00> : vector<16x32xf32>
      %112 = tpu.matmul %108, %111, %cst_87 {dimension_numbers = #tpu.dot_dimension_numbers<[1], [0], [0], [1], [0, 0, 1, 1], [], []>} : vector<16x32xbf16>, vector<32x32xbf16>, vector<16x32xf32> -> vector<16x32xf32>
      %113 = arith.truncf %110 : vector<16x32xf32> to vector<16x32xbf16>
      %114 = vector.shape_cast %113 : vector<16x32xbf16> to vector<1x16x32xbf16>
      %c0_88 = arith.constant 0 : index
      %c0_89 = arith.constant 0 : index
      %c0_90 = arith.constant 0 : index
      %115 = vector.load %arg15[%c0_88, %c0_89, %c0_90] : memref<1x16x32xbf16, #tpu.memory_space<vmem>>, vector<1x16x32xbf16>
      tpu.vector_store %arg15[%c0_88, %c0_89, %c0_90], %114 {strides = array<i32>} : memref<1x16x32xbf16, #tpu.memory_space<vmem>>, vector<1x16x32xbf16>,
      %116 = arith.truncf %112 : vector<16x32xf32> to vector<16x32xbf16>
      %117 = vector.shape_cast %116 : vector<16x32xbf16> to vector<1x16x32xbf16>
      %c0_91 = arith.constant 0 : index
      %c0_92 = arith.constant 0 : index
      %c0_93 = arith.constant 0 : index
      %118 = vector.load %arg16[%c0_91, %c0_92, %c0_93] : memref<1x16x32xbf16, #tpu.memory_space<vmem>>, vector<1x16x32xbf16>
      tpu.vector_store %arg16[%c0_91, %c0_92, %c0_93], %117 {strides = array<i32>} : memref<1x16x32xbf16, #tpu.memory_space<vmem>>, vector<1x16x32xbf16>,
    } else {
    }
    %c0 = arith.constant 0 : index
    %c0_1 = arith.constant 0 : index
    %c0_2 = arith.constant 0 : index
    %3 = vector.load %arg2[%c0, %c0_1, %c0_2] : memref<1x8x32xbf16, #tpu.memory_space<vmem>>, vector<1x8x32xbf16>
    %4 = vector.shape_cast %3 : vector<1x8x32xbf16> to vector<8x32xbf16>
    %c0_3 = arith.constant 0 : index
    %c0_4 = arith.constant 0 : index
    %5 = vector.load %arg6[%c0_3, %c0_4] : memref<32x32xbf16, #tpu.memory_space<vmem>>, vector<32x32xbf16>
    %cst = arith.constant dense<0.000000e+00> : vector<8x32xf32>
    %6 = tpu.matmul %4, %5, %cst {dimension_numbers = #tpu.dot_dimension_numbers<[1], [0], [0], [1], [0, 0, 1, 1], [], []>} : vector<8x32xbf16>, vector<32x32xbf16>, vector<8x32xf32> -> vector<8x32xf32>
    %7 = arith.truncf %6 : vector<8x32xf32> to vector<8x32xbf16>
    %8 = vector.shape_cast %7 : vector<8x32xbf16> to vector<1x8x32xbf16>
    %c0_5 = arith.constant 0 : index
    %c0_6 = arith.constant 0 : index
    %c0_7 = arith.constant 0 : index
    %9 = vector.load %arg14[%c0_5, %c0_6, %c0_7] : memref<1x8x32xbf16, #tpu.memory_space<vmem>>, vector<1x8x32xbf16>
    tpu.vector_store %arg14[%c0_5, %c0_6, %c0_7], %8 {strides = array<i32>} : memref<1x8x32xbf16, #tpu.memory_space<vmem>>, vector<1x8x32xbf16>,
    %c0_8 = arith.constant 0 : index
    %c0_9 = arith.constant 0 : index
    %c0_10 = arith.constant 0 : index
    %10 = vector.load %arg4[%c0_8, %c0_9, %c0_10] : memref<1x8x16xbf16, #tpu.memory_space<vmem>>, vector<1x8x16xbf16>
    %11 = arith.extf %10 : vector<1x8x16xbf16> to vector<1x8x16xf32>
    %c0_11 = arith.constant 0 : index
    %c0_12 = arith.constant 0 : index
    %12 = vector.load %arg5[%c0_11, %c0_12] : memref<8x16xbf16, #tpu.memory_space<vmem>>, vector<8x16xbf16>
    %13 = arith.extf %12 : vector<8x16xbf16> to vector<8x16xf32>
    %14 = vector.shape_cast %13 : vector<8x16xf32> to vector<1x8x16xf32>
    %15 = arith.addf %11, %14 : vector<1x8x16xf32>
    %c0_13 = arith.constant 0 : index
    %c0_14 = arith.constant 0 : index
    %c0_15 = arith.constant 0 : index
    %16 = vector.load %arg14[%c0_13, %c0_14, %c0_15] : memref<1x8x32xbf16, #tpu.memory_space<vmem>>, vector<1x8x8xbf16>
    %c0_16 = arith.constant 0 : index
    %c0_17 = arith.constant 0 : index
    %c0_18 = arith.constant 0 : index
    %17 = vector.load %arg15[%c0_16, %c0_17, %c0_18] : memref<1x16x32xbf16, #tpu.memory_space<vmem>>, vector<1x16x8xbf16>
    %c0_19 = arith.constant 0 : index
    %c0_20 = arith.constant 0 : index
    %c0_21 = arith.constant 0 : index
    %18 = vector.load %arg16[%c0_19, %c0_20, %c0_21] : memref<1x16x32xbf16, #tpu.memory_space<vmem>>, vector<1x16x8xbf16>
    "tpu.trace_start"() <{level = 10 : i32, message = "bqc,bkc->bqk"}> : () -> ()
    %cst_22 = arith.constant dense<0.000000e+00> : vector<1x8x16xf32>
    %19 = tpu.matmul %16, %17, %cst_22 {dimension_numbers = #tpu.dot_dimension_numbers<[2], [2], [1], [1], [0, 0, 0, 1, 1, 1], [0], [0]>} : vector<1x8x8xbf16>, vector<1x16x8xbf16>, vector<1x8x16xf32> -> vector<1x8x16xf32>
    "tpu.trace_stop"() : () -> ()
    %20 = arith.addf %19, %15 : vector<1x8x16xf32>
    %cst_23 = arith.constant dense<0xFF800000> : vector<1x8xf32>
    %21 = vector.multi_reduction <maximumf>, %20, %cst_23 [2] : vector<1x8x16xf32> to vector<1x8xf32>
    %22 = vector.shape_cast %21 : vector<1x8xf32> to vector<1x8x1xf32>
    %23 = vector.broadcast %22 : vector<1x8x1xf32> to vector<1x8x16xf32>
    %24 = arith.subf %20, %23 : vector<1x8x16xf32>
    %25 = math.exp %24 : vector<1x8x16xf32>
    %cst_24 = arith.constant dense<0.000000e+00> : vector<1x8xf32>
    %26 = vector.multi_reduction <add>, %25, %cst_24 [2] : vector<1x8x16xf32> to vector<1x8xf32>
    %27 = vector.shape_cast %26 : vector<1x8xf32> to vector<1x8x1xf32>
    %28 = tpu.reciprocal %27 {approx = true} : vector<1x8x1xf32> -> vector<1x8x1xf32>
    %29 = vector.broadcast %28 : vector<1x8x1xf32> to vector<1x8x16xf32>
    %30 = arith.mulf %25, %29 : vector<1x8x16xf32>
    %31 = arith.truncf %30 : vector<1x8x16xf32> to vector<1x8x16xbf16>
    "tpu.trace_start"() <{level = 10 : i32, message = "bqk,bkc->bqc"}> : () -> ()
    %cst_25 = arith.constant dense<0.000000e+00> : vector<1x8x8xf32>
    %32 = tpu.matmul %31, %18, %cst_25 {dimension_numbers = #tpu.dot_dimension_numbers<[2], [1], [1], [2], [0, 0, 0, 1, 1, 2], [0], [0]>} : vector<1x8x16xbf16>, vector<1x16x8xbf16>, vector<1x8x8xf32> -> vector<1x8x8xf32>
    "tpu.trace_stop"() : () -> ()
    %c0_26 = arith.constant 0 : index
    %c0_27 = arith.constant 0 : index
    %c8 = arith.constant 8 : index
    %33 = vector.load %arg14[%c0_26, %c0_27, %c8] : memref<1x8x32xbf16, #tpu.memory_space<vmem>>, vector<1x8x8xbf16>
    %c0_28 = arith.constant 0 : index
    %c0_29 = arith.constant 0 : index
    %c8_30 = arith.constant 8 : index
    %34 = vector.load %arg15[%c0_28, %c0_29, %c8_30] : memref<1x16x32xbf16, #tpu.memory_space<vmem>>, vector<1x16x8xbf16>
    %c0_31 = arith.constant 0 : index
    %c0_32 = arith.constant 0 : index
    %c8_33 = arith.constant 8 : index
    %35 = vector.load %arg16[%c0_31, %c0_32, %c8_33] : memref<1x16x32xbf16, #tpu.memory_space<vmem>>, vector<1x16x8xbf16>
    "tpu.trace_start"() <{level = 10 : i32, message = "bqc,bkc->bqk"}> : () -> ()
    %cst_34 = arith.constant dense<0.000000e+00> : vector<1x8x16xf32>
    %36 = tpu.matmul %33, %34, %cst_34 {dimension_numbers = #tpu.dot_dimension_numbers<[2], [2], [1], [1], [0, 0, 0, 1, 1, 1], [0], [0]>} : vector<1x8x8xbf16>, vector<1x16x8xbf16>, vector<1x8x16xf32> -> vector<1x8x16xf32>
    "tpu.trace_stop"() : () -> ()
    %37 = arith.addf %36, %15 : vector<1x8x16xf32>
    %cst_35 = arith.constant dense<0xFF800000> : vector<1x8xf32>
    %38 = vector.multi_reduction <maximumf>, %37, %cst_35 [2] : vector<1x8x16xf32> to vector<1x8xf32>
    %39 = vector.shape_cast %38 : vector<1x8xf32> to vector<1x8x1xf32>
    %40 = vector.broadcast %39 : vector<1x8x1xf32> to vector<1x8x16xf32>
    %41 = arith.subf %37, %40 : vector<1x8x16xf32>
    %42 = math.exp %41 : vector<1x8x16xf32>
    %cst_36 = arith.constant dense<0.000000e+00> : vector<1x8xf32>
    %43 = vector.multi_reduction <add>, %42, %cst_36 [2] : vector<1x8x16xf32> to vector<1x8xf32>
    %44 = vector.shape_cast %43 : vector<1x8xf32> to vector<1x8x1xf32>
    %45 = tpu.reciprocal %44 {approx = true} : vector<1x8x1xf32> -> vector<1x8x1xf32>
    %46 = vector.broadcast %45 : vector<1x8x1xf32> to vector<1x8x16xf32>
    %47 = arith.mulf %42, %46 : vector<1x8x16xf32>
    %48 = arith.truncf %47 : vector<1x8x16xf32> to vector<1x8x16xbf16>
    "tpu.trace_start"() <{level = 10 : i32, message = "bqk,bkc->bqc"}> : () -> ()
    %cst_37 = arith.constant dense<0.000000e+00> : vector<1x8x8xf32>
    %49 = tpu.matmul %48, %35, %cst_37 {dimension_numbers = #tpu.dot_dimension_numbers<[2], [1], [1], [2], [0, 0, 0, 1, 1, 2], [0], [0]>} : vector<1x8x16xbf16>, vector<1x16x8xbf16>, vector<1x8x8xf32> -> vector<1x8x8xf32>
    "tpu.trace_stop"() : () -> ()
    %c0_38 = arith.constant 0 : index
    %c0_39 = arith.constant 0 : index
    %c16 = arith.constant 16 : index
    %50 = vector.load %arg14[%c0_38, %c0_39, %c16] : memref<1x8x32xbf16, #tpu.memory_space<vmem>>, vector<1x8x8xbf16>
    %c0_40 = arith.constant 0 : index
    %c0_41 = arith.constant 0 : index
    %c16_42 = arith.constant 16 : index
    %51 = vector.load %arg15[%c0_40, %c0_41, %c16_42] : memref<1x16x32xbf16, #tpu.memory_space<vmem>>, vector<1x16x8xbf16>
    %c0_43 = arith.constant 0 : index
    %c0_44 = arith.constant 0 : index
    %c16_45 = arith.constant 16 : index
    %52 = vector.load %arg16[%c0_43, %c0_44, %c16_45] : memref<1x16x32xbf16, #tpu.memory_space<vmem>>, vector<1x16x8xbf16>
    "tpu.trace_start"() <{level = 10 : i32, message = "bqc,bkc->bqk"}> : () -> ()
    %cst_46 = arith.constant dense<0.000000e+00> : vector<1x8x16xf32>
    %53 = tpu.matmul %50, %51, %cst_46 {dimension_numbers = #tpu.dot_dimension_numbers<[2], [2], [1], [1], [0, 0, 0, 1, 1, 1], [0], [0]>} : vector<1x8x8xbf16>, vector<1x16x8xbf16>, vector<1x8x16xf32> -> vector<1x8x16xf32>
    "tpu.trace_stop"() : () -> ()
    %54 = arith.addf %53, %15 : vector<1x8x16xf32>
    %cst_47 = arith.constant dense<0xFF800000> : vector<1x8xf32>
    %55 = vector.multi_reduction <maximumf>, %54, %cst_47 [2] : vector<1x8x16xf32> to vector<1x8xf32>
    %56 = vector.shape_cast %55 : vector<1x8xf32> to vector<1x8x1xf32>
    %57 = vector.broadcast %56 : vector<1x8x1xf32> to vector<1x8x16xf32>
    %58 = arith.subf %54, %57 : vector<1x8x16xf32>
    %59 = math.exp %58 : vector<1x8x16xf32>
    %cst_48 = arith.constant dense<0.000000e+00> : vector<1x8xf32>
    %60 = vector.multi_reduction <add>, %59, %cst_48 [2] : vector<1x8x16xf32> to vector<1x8xf32>
    %61 = vector.shape_cast %60 : vector<1x8xf32> to vector<1x8x1xf32>
    %62 = tpu.reciprocal %61 {approx = true} : vector<1x8x1xf32> -> vector<1x8x1xf32>
    %63 = vector.broadcast %62 : vector<1x8x1xf32> to vector<1x8x16xf32>
    %64 = arith.mulf %59, %63 : vector<1x8x16xf32>
    %65 = arith.truncf %64 : vector<1x8x16xf32> to vector<1x8x16xbf16>
    "tpu.trace_start"() <{level = 10 : i32, message = "bqk,bkc->bqc"}> : () -> ()
    %cst_49 = arith.constant dense<0.000000e+00> : vector<1x8x8xf32>
    %66 = tpu.matmul %65, %52, %cst_49 {dimension_numbers = #tpu.dot_dimension_numbers<[2], [1], [1], [2], [0, 0, 0, 1, 1, 2], [0], [0]>} : vector<1x8x16xbf16>, vector<1x16x8xbf16>, vector<1x8x8xf32> -> vector<1x8x8xf32>
    "tpu.trace_stop"() : () -> ()
    %c0_50 = arith.constant 0 : index
    %c0_51 = arith.constant 0 : index
    %c24 = arith.constant 24 : index
    %67 = vector.load %arg14[%c0_50, %c0_51, %c24] : memref<1x8x32xbf16, #tpu.memory_space<vmem>>, vector<1x8x8xbf16>
    %c0_52 = arith.constant 0 : index
    %c0_53 = arith.constant 0 : index
    %c24_54 = arith.constant 24 : index
    %68 = vector.load %arg15[%c0_52, %c0_53, %c24_54] : memref<1x16x32xbf16, #tpu.memory_space<vmem>>, vector<1x16x8xbf16>
    %c0_55 = arith.constant 0 : index
    %c0_56 = arith.constant 0 : index
    %c24_57 = arith.constant 24 : index
    %69 = vector.load %arg16[%c0_55, %c0_56, %c24_57] : memref<1x16x32xbf16, #tpu.memory_space<vmem>>, vector<1x16x8xbf16>
    "tpu.trace_start"() <{level = 10 : i32, message = "bqc,bkc->bqk"}> : () -> ()
    %cst_58 = arith.constant dense<0.000000e+00> : vector<1x8x16xf32>
    %70 = tpu.matmul %67, %68, %cst_58 {dimension_numbers = #tpu.dot_dimension_numbers<[2], [2], [1], [1], [0, 0, 0, 1, 1, 1], [0], [0]>} : vector<1x8x8xbf16>, vector<1x16x8xbf16>, vector<1x8x16xf32> -> vector<1x8x16xf32>
    "tpu.trace_stop"() : () -> ()
    %71 = arith.addf %70, %15 : vector<1x8x16xf32>
    %cst_59 = arith.constant dense<0xFF800000> : vector<1x8xf32>
    %72 = vector.multi_reduction <maximumf>, %71, %cst_59 [2] : vector<1x8x16xf32> to vector<1x8xf32>
    %73 = vector.shape_cast %72 : vector<1x8xf32> to vector<1x8x1xf32>
    %74 = vector.broadcast %73 : vector<1x8x1xf32> to vector<1x8x16xf32>
    %75 = arith.subf %71, %74 : vector<1x8x16xf32>
    %76 = math.exp %75 : vector<1x8x16xf32>
    %cst_60 = arith.constant dense<0.000000e+00> : vector<1x8xf32>
    %77 = vector.multi_reduction <add>, %76, %cst_60 [2] : vector<1x8x16xf32> to vector<1x8xf32>
    %78 = vector.shape_cast %77 : vector<1x8xf32> to vector<1x8x1xf32>
    %79 = tpu.reciprocal %78 {approx = true} : vector<1x8x1xf32> -> vector<1x8x1xf32>
    %80 = vector.broadcast %79 : vector<1x8x1xf32> to vector<1x8x16xf32>
    %81 = arith.mulf %76, %80 : vector<1x8x16xf32>
    %82 = arith.truncf %81 : vector<1x8x16xf32> to vector<1x8x16xbf16>
    "tpu.trace_start"() <{level = 10 : i32, message = "bqk,bkc->bqc"}> : () -> ()
    %cst_61 = arith.constant dense<0.000000e+00> : vector<1x8x8xf32>
    %83 = tpu.matmul %82, %69, %cst_61 {dimension_numbers = #tpu.dot_dimension_numbers<[2], [1], [1], [2], [0, 0, 0, 1, 1, 2], [0], [0]>} : vector<1x8x16xbf16>, vector<1x16x8xbf16>, vector<1x8x8xf32> -> vector<1x8x8xf32>
    "tpu.trace_stop"() : () -> ()
    %84 = tpu.concatenate %32, %49, %66, %83 in 2 : vector<1x8x8xf32>, vector<1x8x8xf32>, vector<1x8x8xf32>, vector<1x8x8xf32> -> vector<1x8x32xf32>
    %85 = vector.shape_cast %84 : vector<1x8x32xf32> to vector<8x32xf32>
    %c0_62 = arith.constant 0 : index
    %c0_63 = arith.constant 0 : index
    %c0_64 = arith.constant 0 : index
    %86 = vector.load %arg2[%c0_62, %c0_63, %c0_64] : memref<1x8x32xbf16, #tpu.memory_space<vmem>>, vector<1x8x32xbf16>
    %87 = vector.shape_cast %86 : vector<1x8x32xbf16> to vector<8x32xbf16>
    %c0_65 = arith.constant 0 : index
    %c0_66 = arith.constant 0 : index
    %88 = vector.load %arg9[%c0_65, %c0_66] : memref<32x32xbf16, #tpu.memory_space<vmem>>, vector<32x32xbf16>
    %cst_67 = arith.constant dense<0.000000e+00> : vector<8x32xf32>
    %89 = tpu.matmul %87, %88, %cst_67 {dimension_numbers = #tpu.dot_dimension_numbers<[1], [0], [0], [1], [0, 0, 1, 1], [], []>} : vector<8x32xbf16>, vector<32x32xbf16>, vector<8x32xf32> -> vector<8x32xf32>
    %c0_68 = arith.constant 0 : index
    %c0_69 = arith.constant 0 : index
    %90 = vector.load %arg10[%c0_68, %c0_69] : memref<1x32xf32, #tpu.memory_space<vmem>>, vector<1x32xf32>
    %91 = vector.broadcast %90 : vector<1x32xf32> to vector<8x32xf32>
    %92 = arith.addf %89, %91 : vector<8x32xf32>
    %93 = arith.negf %92 : vector<8x32xf32>
    %94 = math.exp %93 : vector<8x32xf32>
    %cst_70 = arith.constant 1.000000e+00 : f32
    %95 = vector.broadcast %cst_70 : f32 to vector<8x32xf32>
    %96 = arith.addf %95, %94 : vector<8x32xf32>
    %97 = arith.divf %95, %96 : vector<8x32xf32>
    %98 = arith.mulf %85, %97 : vector<8x32xf32>
    %99 = arith.truncf %98 : vector<8x32xf32> to vector<8x32xbf16>
    %c0_71 = arith.constant 0 : index
    %c0_72 = arith.constant 0 : index
    %100 = vector.load %arg11[%c0_71, %c0_72] : memref<32x16xbf16, #tpu.memory_space<vmem>>, vector<32x16xbf16>
    %cst_73 = arith.constant dense<0.000000e+00> : vector<8x16xf32>
    %101 = tpu.matmul %99, %100, %cst_73 {dimension_numbers = #tpu.dot_dimension_numbers<[1], [0], [0], [1], [0, 0, 1, 1], [], []>} : vector<8x32xbf16>, vector<32x16xbf16>, vector<8x16xf32> -> vector<8x16xf32>
    %c0_74 = arith.constant 0 : index
    %c0_75 = arith.constant 0 : index
    %102 = vector.load %arg12[%c0_74, %c0_75] : memref<1x16xf32, #tpu.memory_space<vmem>>, vector<1x16xf32>
    %103 = vector.broadcast %102 : vector<1x16xf32> to vector<8x16xf32>
    %104 = arith.addf %101, %103 : vector<8x16xf32>
    %105 = vector.shape_cast %104 : vector<8x16xf32> to vector<1x8x16xf32>
    %c0_76 = arith.constant 0 : index
    %c0_77 = arith.constant 0 : index
    %c0_78 = arith.constant 0 : index
    %106 = vector.load %arg13[%c0_76, %c0_77, %c0_78] : memref<1x8x16xf32, #tpu.memory_space<vmem>>, vector<1x8x16xf32>
    tpu.vector_store %arg13[%c0_76, %c0_77, %c0_78], %105 {strides = array<i32>} : memref<1x8x16xf32, #tpu.memory_space<vmem>>, vector<1x8x16xf32>,
    return
  }
  func.func @transform_0(%arg0: i32, %arg1: i32) -> (i32, i32, i32) {
    %c0_i32 = arith.constant 0 : i32
    %c0_i32_0 = arith.constant 0 : i32
    return %arg0, %arg1, %c0_i32 : i32, i32, i32
  }
  func.func @transform_1(%arg0: i32, %arg1: i32) -> (i32, i32, i32) {
    %c0_i32 = arith.constant 0 : i32
    %c0_i32_0 = arith.constant 0 : i32
    %c0_i32_1 = arith.constant 0 : i32
    return %arg0, %c0_i32, %c0_i32_0 : i32, i32, i32
  }
  func.func @transform_2(%arg0: i32, %arg1: i32) -> (i32, i32, i32) {
    %c0_i32 = arith.constant 0 : i32
    %c0_i32_0 = arith.constant 0 : i32
    return %arg0, %arg1, %c0_i32 : i32, i32, i32
  }
  func.func @transform_3(%arg0: i32, %arg1: i32) -> (i32, i32) {
    %c0_i32 = arith.constant 0 : i32
    %c0_i32_0 = arith.constant 0 : i32
    return %arg1, %c0_i32 : i32, i32
  }
  func.func @transform_4(%arg0: i32, %arg1: i32) -> (i32, i32) {
    %c0_i32 = arith.constant 0 : i32
    %c0_i32_0 = arith.constant 0 : i32
    %c0_i32_1 = arith.constant 0 : i32
    return %c0_i32, %c0_i32_0 : i32, i32
  }
  func.func @transform_5(%arg0: i32, %arg1: i32) -> (i32, i32) {
    %c0_i32 = arith.constant 0 : i32
    %c0_i32_0 = arith.constant 0 : i32
    %c0_i32_1 = arith.constant 0 : i32
    return %c0_i32, %c0_i32_0 : i32, i32
  }
  func.func @transform_6(%arg0: i32, %arg1: i32) -> (i32, i32) {
    %c0_i32 = arith.constant 0 : i32
    %c0_i32_0 = arith.constant 0 : i32
    %c0_i32_1 = arith.constant 0 : i32
    return %c0_i32, %c0_i32_0 : i32, i32
  }
  func.func @transform_7(%arg0: i32, %arg1: i32) -> (i32, i32) {
    %c0_i32 = arith.constant 0 : i32
    %c0_i32_0 = arith.constant 0 : i32
    %c0_i32_1 = arith.constant 0 : i32
    return %c0_i32, %c0_i32_0 : i32, i32
  }
  func.func @transform_8(%arg0: i32, %arg1: i32) -> (i32, i32) {
    %c0_i32 = arith.constant 0 : i32
    %c0_i32_0 = arith.constant 0 : i32
    %c0_i32_1 = arith.constant 0 : i32
    return %c0_i32, %c0_i32_0 : i32, i32
  }
  func.func @transform_9(%arg0: i32, %arg1: i32) -> (i32, i32) {
    %c0_i32 = arith.constant 0 : i32
    %c0_i32_0 = arith.constant 0 : i32
    %c0_i32_1 = arith.constant 0 : i32
    return %c0_i32, %c0_i32_0 : i32, i32
  }
  func.func @transform_10(%arg0: i32, %arg1: i32) -> (i32, i32) {
    %c0_i32 = arith.constant 0 : i32
    %c0_i32_0 = arith.constant 0 : i32
    %c0_i32_1 = arith.constant 0 : i32
    return %c0_i32, %c0_i32_0 : i32, i32
  }
  func.func @transform_11(%arg0: i32, %arg1: i32) -> (i32, i32, i32) {
    %c0_i32 = arith.constant 0 : i32
    %c0_i32_0 = arith.constant 0 : i32
    return %arg0, %arg1, %c0_i32 : i32, i32, i32
  }
}

</mosaic_0001>

<bundles_post_ra>
// kernel: tpu_custom_call.1
= control target key start
LH: loop header
LB: loop body
LE: loop exit
PB: predicated region body
PF: predicated region fallthrough
CT: control target
= control target key end

     0   :  { %s2561_s0 = inlined_call_operand.hbm [shape: bf16[2,8,32], index: 0, kind: input, shape index: {}]   ;;  %s2562_s1 = inlined_call_operand.vmem [shape: bf16[2,16,32], index: 1, kind: input, shape index: {}]   ;;  %s2563_s2 = inlined_call_operand.hbm [shape: bf16[2,8,16], index: 2, kind: input, shape index: {}]   ;;  %s2564_s3 = inlined_call_operand.hbm [shape: bf16[8,16], index: 3, kind: input, shape index: {}]   ;;  %s2565_s4 = inlined_call_operand.vmem [shape: bf16[32,32], index: 4, kind: input, shape index: {}]   ;;  %s2566_s5 = inlined_call_operand.hbm [shape: bf16[32,32], index: 5, kind: input, shape index: {}]   ;;  %s2567_s6 = inlined_call_operand.hbm [shape: bf16[32,32], index: 6, kind: input, shape index: {}]   ;;  %s2568_s7 = inlined_call_operand.vmem [shape: bf16[32,32], index: 7, kind: input, shape index: {}]   ;;  %s2569_s8 = inlined_call_operand.vmem [shape: f32[1,32], index: 8, kind: input, shape index: {}]   ;;  %s2570_s9 = inlined_call_operand.vmem [shape: bf16[32,16], index: 9, kind: input, shape index: {}]   ;;  %s2571_s10 = inlined_call_operand.vmem [shape: f32[1,16], index: 10, kind: input, shape index: {}]   ;;  %s2572_s11 = inlined_call_operand.hbm [shape: f32[2,8,16], index: 11, kind: output, shape index: {}]  }
   0x1   :  { %2582 = sst [smem:[#allocation24_spill]] %s2564_s3 }
   0x2   :  { %2583 = sst [smem:[#allocation25_spill]] %s2566_s5 }
   0x3   :  { %2584 = sst [smem:[#allocation26_spill]] %s2567_s6 }
   0x4   :  { %2585 = sst [smem:[#allocation27_spill]] %s2569_s8 }
   0x5   :  { %2586 = sst [smem:[#allocation28_spill]] %s2571_s10 }
   0x6   :  { %2587 = sst [smem:[#allocation29_spill]] %s2572_s11 }
   0x7   :  { %16 = vsyncpa [#allocation6], 0 }
   0x8   :  { %18 = vsyncpa [#allocation6 + $0x1], 0 }
   0x9   :  { %19 = vsyncpa [#allocation9], 0 }
   0xa   :  { %21 = vsyncpa [#allocation9 + $0x1], 0 }
   0xb   :  { %22 = vsyncpa [#allocation12], 0 }
   0xc   :  { %23 = vsyncpa [#allocation7], 0 }
   0xd   :  { %25 = vsyncpa [#allocation7 + $0x1], 0  ;;  %s2135_s17 = smov 0   ;;  %s2137_s18 = smov 0  }
   0xe   :  { %s2139_s19 = smov 0   ;;  %s2141_s20 = smov 0  }
   0xf   :  { %s2143_s21 = smov 0   ;;  %s2145_s22 = smov 0  }
  0x10 LB: > { %2588 = sst [smem:[#allocation20_spill]] %s2037_s17  ;;  %s2166_s23 = sadd.s32 4294967295, %s2057_s22   ;;  %s2057_s22 = sphi %s2145_s22, %s31_s22   ;;  %s2053_s21 = sphi %s2143_s21, %s2618_s21   ;;  %s2049_s20 = sphi %s2141_s20, %s2617_s20   ;;  %s2045_s19 = sphi %s2139_s19, %s2621_s19   ;;  %s2041_s18 = sphi %s2137_s18, %s2620_s18   ;;  %s2037_s17 = sphi %s2135_s17, %s2619_s17  }
  0x11   : > { %2589 = sst [smem:[#allocation21_spill]] %s2053_s21  ;;  %s1504_s24 = sadd.s32 4294967294, %s2057_s22  }
  0x12   : > { %p65_p0 = scmp.ne.s32.totalorder %s2041_s18, %s2037_s17  ;;  %p2576_p1 = scmp.eq.s32.totalorder %s2166_s23, 0 }
  0x13   : > { %p324_p3 = scmp.eq.s32.totalorder %s1504_s24, 1  ;;  %p1505_p5 = scmp.ge.s32.totalorder %s2057_s22, 1 }
  0x14   : > { %p2175_p4 = por %p2576_p1, %p65_p0  ;;  %p331_p7 = scmp.lt.s32.totalorder %s2057_s22, 3 }
  0x15   : > { %p2180_p6 = por %p324_p3, %p65_p0  ;;  %s2059_s28 = smov [#allocation10]  }
  0x16   : > { %s2590_s25 = scalar_select %p2175_p4, 1, 0 }
  0x17   : > { %s2591_s26 = scalar_select %p2180_p6, 1, 0 }
  0x18   : > { %p2185_p8 = pnand %p1505_p5, %p331_p7  ;;  %s346_s29 = sshll.u32 %s2059_s28, 4  ;;  %s347_s29 = int_to_ptr.vmem [resolvable:$true] %s346_s29 }
  0x19   : > { %2592 = sst [smem:[#allocation22_spill]] %s2591_s26  ;;  %s2060_s30 = smov [#allocation11]  }
  0x1a   : > { %s2593_s27 = scalar_select %p2185_p8, 1, 0 }
  0x1b   : > { %p1695_p10 = pneg %p2185_p8  ;;  %s359_s12 = sshll.u32 %s2060_s30, 4  ;;  %s2198_s12 = int_to_ptr.vmem [resolvable:$true] %s359_s12 }
  0x1c   : > { %s2061_s14 = smov [#allocation13]   ;;  %s2595_s3 = sld [smem:[#allocation24_spill]] }
  0x1d   : > { %p2194_p11 = pnand %p1695_p10, %p2576_p1  ;;  %s2200_s15 = sshll.u32 %s2061_s14, 4  ;;  %s373_s15 = int_to_ptr.vmem [resolvable:$true] %s2200_s15 }
  0x1f   : > { %p2210_p13 = pneg %p2194_p11 }
  0x22   : > { %s1819_s28 = scalar_lea.hbm %s2595_s3, 64 }
  0x23   : > { %p1820_p12 = scmp.ne.s32.totalorder %s2595_s3, %s1819_s28  ;;  %p1826_p5 = scmp.lt.u32.totalorder %s1819_s28, %s2595_s3 }
  0x25   : > { %p1822_p0 = pnand %p2210_p13, %p1820_p12 }
  0x27   : > { %p1823_p3 = pneg %p1822_p0 }
  0x29   : > { %p1828_p7 = pnand %p1826_p5, %p1823_p3 }
  0x2b   : > { %1831 = shalt.err (!%p1828_p7)
}
  0x2c   : > { %s1832_s16 = scalar_lea.vmem %s347_s29, 64  ;;  %p1840_p2 = scmp.lt.s32.totalorder %s347_s29, %s347_s29 }
  0x2d   : > { %p1833_p10 = scmp.ne.s32.totalorder %s347_s29, %s1832_s16  ;;  %p1841_p6 = scmp.lt.s32.totalorder %s1832_s16, %s1832_s16 }
  0x2f   : > { %p1835_p9 = pnand %p1833_p10, %p2210_p13  ;;  %p1842_p4 = por %p1841_p6, %p1840_p2 }
  0x31   : > { %p1836_p1 = pneg %p1835_p9 }
  0x33   : > { %p1843_p8 = pnand %p1842_p4, %p1836_p1 }
  0x35   : > { %1846 = shalt.err (!%p1843_p8)
}
  0x36   : > { %1698 = dma.hbm_to_vmem [thread:$0]  (!%p2194_p11), %s2595_s3, 64, %s347_s29, [#allocation9]  }
  0x37   : > { %s2597_s5 = sld [smem:[#allocation25_spill]] }
  0x3d   : > { %s1847_s28 = scalar_lea.hbm %s2597_s5, 256 }
  0x3e   : > { %p1848_p9 = scmp.ne.s32.totalorder %s2597_s5, %s1847_s28  ;;  %p1854_p1 = scmp.lt.u32.totalorder %s1847_s28, %s2597_s5 }
  0x40   : > { %p1850_p12 = pnand %p1848_p9, %p2210_p13 }
  0x42   : > { %p1851_p2 = pneg %p1850_p12 }
  0x44   : > { %p1856_p4 = pnand %p1854_p1, %p1851_p2 }
  0x46   : > { %1859 = shalt.err (!%p1856_p4)
}
  0x47   : > { %s1860_s29 = scalar_lea.vmem %s2198_s12, 256  ;;  %p1868_p3 = scmp.lt.s32.totalorder %s2198_s12, %s2198_s12 }
  0x48   : > { %p1861_p6 = scmp.ne.s32.totalorder %s2198_s12, %s1860_s29  ;;  %p1869_p5 = scmp.lt.s32.totalorder %s1860_s29, %s1860_s29 }
  0x4a   : > { %p1863_p8 = pnand %p1861_p6, %p2210_p13  ;;  %p1870_p7 = por %p1869_p5, %p1868_p3 }
  0x4c   : > { %p1864_p0 = pneg %p1863_p8 }
  0x4e   : > { %p1871_p10 = pnand %p1870_p7, %p1864_p0 }
  0x50   : > { %1874 = shalt.err (!%p1871_p10)
}
  0x51   : > { %s2062_s10 = smov 64   ;;  %s2063_s8 = smov 4  }
  0x52   : > { %1701 = dma.hbm_to_vmem [thread:$0]  (!%p2194_p11), %s2597_s5, 256, %s2198_s12, [#allocation12], %s2062_s10, %s2062_s10, %s2063_s8  }
  0x53   : > { %s2598_s6 = sld [smem:[#allocation26_spill]] }
  0x59   : > { %s1875_s28 = scalar_lea.hbm %s2598_s6, 256 }
  0x5a   : > { %p1876_p9 = scmp.ne.s32.totalorder %s2598_s6, %s1875_s28  ;;  %p1882_p1 = scmp.lt.u32.totalorder %s1875_s28, %s2598_s6 }
  0x5c   : > { %p1878_p12 = pnand %p1876_p9, %p2210_p13 }
  0x5e   : > { %p1879_p2 = pneg %p1878_p12 }
  0x60   : > { %p1884_p4 = pnand %p1882_p1, %p1879_p2 }
  0x62   : > { %1887 = shalt.err (!%p1884_p4)
}
  0x63   : > { %s1888_s17 = scalar_lea.vmem %s373_s15, 256  ;;  %p1896_p3 = scmp.lt.s32.totalorder %s373_s15, %s373_s15 }
  0x64   : > { %p1889_p6 = scmp.ne.s32.totalorder %s373_s15, %s1888_s17  ;;  %p1897_p5 = scmp.lt.s32.totalorder %s1888_s17, %s1888_s17 }
  0x66   : > { %p1891_p8 = pnand %p1889_p6, %p2210_p13  ;;  %p1898_p7 = por %p1897_p5, %p1896_p3 }
  0x68   : > { %p1892_p0 = pneg %p1891_p8 }
  0x6a   : > { %p1899_p10 = pnand %p1898_p7, %p1892_p0 }
  0x6c   : > { %1902 = shalt.err (!%p1899_p10)
}
  0x6d   : > { %1704 = dma.hbm_to_vmem [thread:$0]  (!%p2194_p11), %s2598_s6, 256, %s373_s15, [#allocation12], %s2062_s10, %s2062_s10, %s2063_s8  }
  0x6e   : > { %s52_s3 = sadd.s32 1, %s2045_s19  ;;  %s43_s30 = sadd.s32 1, %s2053_s21 }
  0x6f   : > { %p59_p13 = scmp.ne.s32.totalorder %s2045_s19, %s2041_s18  ;;  %p45_p9 = scmp.ge.s32.totalorder %s43_s30, 2 }
  0x70   : > { %p60_p12 = scmp.eq.s32.totalorder %s2057_s22, 0  ;;  %p2599_p2 = scmp.eq.s32.totalorder %s2166_s23, 1 }
  0x71   : > { %p1719_p4 = scmp.lt.s32.totalorder %s2057_s22, 2  ;;  %s2623_s30 = smov (%p45_p9, %s43_s30), 0 }
  0x72   : > { %p2275_p1 = por %p2599_p2, %p59_p13  ;;  %2601 = sst [smem:[#allocation23_spill]] %s2623_s30 }
  0x73   : > { %p61_p6 = por %p60_p12, %p59_p13  ;;  %s398_s11 = sand.u32 1, %s2045_s19  }
  0x74   : > { %s2600_s13 = scalar_select %p2275_p1, 1, 0 }
  0x75   : > { %s47_s24 = ssub.s32 %s2053_s21, %s2623_s30  ;;  %s2285_s15 = sshll.u32 %s398_s11, 2 }
  0x76   : > { %p50_p11 = scmp.eq.s32.totalorder %s47_s24, 0  ;;  %s1511_s10 = sshll.u32 %s2053_s21, 6 }
  0x77   : > { %s2294_s16 = scalar_lea.hbm %s2561_s0, %s1511_s10  ;;  %s402_s29 = scalar_lea.vmem [#allocation5], %s2285_s15 }
  0x78   : > { %s2289_s8 = scalar_select %p50_p11, %s2045_s19, %s52_s3  }
  0x79   : > { %s410_s17 = sshll.u32 %s402_s29, 4  ;;  %p2301_p8 = pnand %p1719_p4, %p61_p6  ;;  %s2297_s17 = int_to_ptr.vmem [resolvable:$true] %s410_s17 }
  0x7a   : > { %s2308_s24 = scalar_lea.hbm %s2563_s2, %s1511_s10  ;;  %s425_s28 = sand.u32 1, %s2057_s22  }
  0x7b   : > { %s399_s14 = scalar_lea.sflag [#allocation6], %s398_s11  ;;  %s1903_s5 = scalar_lea.hbm %s2294_s16, 64 }
  0x7c   : > { %p1904_p0 = scmp.ne.s32.totalorder %s2294_s16, %s1903_s5  ;;  %p1905_p3 = pneg %p2301_p8 }
  0x7d   : > { %s1908_s30 = scalar_lea.hbm %s2561_s0, 128  ;;  %p1909_p10 = scmp.lt.u32.totalorder %s2294_s16, %s2561_s0 }
  0x7e   : > { %p1906_p5 = pnand %p1905_p3, %p1904_p0  ;;  %p1910_p13 = scmp.lt.u32.totalorder %s1908_s30, %s1903_s5 }
  0x7f   : > { %p1912_p12 = scmp.lt.u32.totalorder %s1903_s5, %s2294_s16 }
  0x80   : > { %p1907_p7 = pneg %p1906_p5  ;;  %p1911_p9 = por %p1910_p13, %p1909_p10 }
  0x82   : > { %p1913_p2 = por %p1912_p12, %p1911_p9 }
  0x84   : > { %p1914_p4 = pnand %p1913_p2, %p1907_p7 }
  0x86   : > { %1917 = shalt.err (!%p1914_p4)
}
  0x87   : > { %s1918_s11 = scalar_lea.vmem %s2297_s17, 64  ;;  %s2064_s6 = smov [#allocation5]  }
  0x88   : > { %p1919_p6 = scmp.ne.s32.totalorder %s2297_s17, %s1918_s11  ;;  %s1923_s10 = sshll.u32 %s2064_s6, 4  ;;  %s1924_s10 = int_to_ptr.vmem [resolvable:$false] %s1923_s10 }
  0x89   : > { %s1925_s21 = scalar_lea.vmem %s1924_s10, 128  ;;  %p1926_p5 = scmp.lt.s32.totalorder %s2297_s17, %s1924_s10 }
  0x8a   : > { %p1921_p11 = pnand %p1919_p6, %p1905_p3  ;;  %p1927_p10 = scmp.lt.s32.totalorder %s1925_s21, %s1918_s11 }
  0x8c   : > { %p1922_p0 = pneg %p1921_p11  ;;  %p1928_p13 = por %p1927_p10, %p1926_p5 }
  0x8e   : > { %p1929_p9 = pnand %p1928_p13, %p1922_p0 }
  0x90   : > { %1932 = shalt.err (!%p1929_p9)
}
  0x91   : > { %1708 = dma.hbm_to_vmem [thread:$0]  (!%p2301_p8), %s2294_s16, 64, %s2297_s17, %s399_s14  }
  0x92   : > { %s429_s5 = scalar_lea.vmem [#allocation8], %s2285_s15  ;;  %s426_s3 = scalar_lea.sflag [#allocation9], %s425_s28 }
  0x93   : > { %s437_s30 = sshll.u32 %s429_s5, 4  ;;  %s1933_s29 = scalar_lea.hbm %s2308_s24, 64  ;;  %s438_s30 = int_to_ptr.vmem [resolvable:$true] %s437_s30 }
  0x94   : > { %p1934_p7 = scmp.ne.s32.totalorder %s2308_s24, %s1933_s29  ;;  %s1938_s6 = scalar_lea.hbm %s2563_s2, 128 }
  0x95   : > { %p1939_p4 = scmp.lt.u32.totalorder %s2308_s24, %s2563_s2  ;;  %p1940_p6 = scmp.lt.u32.totalorder %s1938_s6, %s1933_s29 }
  0x96   : > { %p1936_p12 = pnand %p1934_p7, %p1905_p3  ;;  %p1942_p0 = scmp.lt.u32.totalorder %s1933_s29, %s2308_s24 }
  0x97   : > { %p1941_p11 = por %p1940_p6, %p1939_p4 }
  0x98   : > { %p1937_p2 = pneg %p1936_p12 }
  0x99   : > { %p1943_p5 = por %p1942_p0, %p1941_p11 }
  0x9b   : > { %p1944_p10 = pnand %p1943_p5, %p1937_p2 }
  0x9d   : > { %1947 = shalt.err (!%p1944_p10)
}
  0x9e   : > { %s1948_s15 = scalar_lea.vmem %s438_s30, 64  ;;  %s2065_s16 = smov [#allocation8]  }
  0x9f   : > { %p1949_p13 = scmp.ne.s32.totalorder %s438_s30, %s1948_s15  ;;  %s1953_s17 = sshll.u32 %s2065_s16, 4  ;;  %s1954_s17 = int_to_ptr.vmem [resolvable:$false] %s1953_s17 }
  0xa0   : > { %s1955_s28 = scalar_lea.vmem %s1954_s17, 128  ;;  %p1956_p12 = scmp.lt.s32.totalorder %s438_s30, %s1954_s17 }
  0xa1   : > { %p1951_p9 = pnand %p1949_p13, %p1905_p3  ;;  %p1957_p1 = scmp.lt.s32.totalorder %s1955_s28, %s1948_s15 }
  0xa3   : > { %p1952_p7 = pneg %p1951_p9  ;;  %p1958_p4 = por %p1957_p1, %p1956_p12 }
  0xa5   : > { %p1959_p6 = pnand %p1958_p4, %p1952_p7 }
  0xa7   : > { %1962 = shalt.err (!%p1959_p6)
}
  0xa8   : > { %1711 = dma.hbm_to_vmem [thread:$0]  (!%p2301_p8), %s2308_s24, 64, %s438_s30, %s426_s3  }
  0xa9   : > { %p2603_p2 = scmp.ne.s32.totalorder %s2593_s27, 0 }
  0xaa   : > { %s2361_s14 = sand.u32 (!%p2603_p2), 1, %s2041_s18   ;;  %p2604_p1 = scmp.ne.s32.totalorder (!%p2603_p2), %s2590_s25, 0 }
  0xab   : > { %446 = sbr.rel (%p2603_p2) target bundleno = 1652 (0x674), region = 64  ;;  %s1515_s5 = sshll.u32 (!%p2603_p2), %s2361_s14, 2 }
  0xac   : > { %s449_s29 = scalar_lea.sflag (!%p2603_p2), [#allocation6], %s2361_s14  ;;  %s2365_s26 = scalar_lea.vmem (!%p2603_p2), [#allocation5], %s1515_s5 }
  0xb2   : > { %2016 = dma.done.wait (%p2604_p1), %s449_s29, 64  }
  0xb3   : > { %2018 = vsyncadd (%p2604_p1), %s449_s29, 4294967232  ;;  %s457_s12 = sand.u32 1, %s2166_s23   ;;  %s2372_s24 = scalar_lea.vmem [#allocation8], %s1515_s5 }
  0xb4   : > { %s458_s27 = scalar_lea.sflag [#allocation9], %s457_s12 }
  0xb5   : > { %2020 = dma.done.wait (%p2604_p1), %s458_s27, 64  }
  0xb6   : > { %2022 = vsyncadd (%p2604_p1), %s458_s27, 4294967232  ;;  %p2605_p8 = scmp.eq.s32.totalorder %s2166_s23, 0 }
  0xb8   : > { %2024 = dma.done.wait (%p2605_p8), [#allocation9], 64   ;;  %p2606_p3 = pmov %p2605_p8 }
  0xba   : > { %2026 = vsyncadd (%p2606_p3), [#allocation9], 4294967232  ;;  %p2607_p11 = pmov %p2606_p3 }
  0xbb   : > { %p2608_p0 = pmov %p2606_p3 }
  0xbc   : > { %2028 = dma.done.wait (%p2607_p11), [#allocation12], 512  }
  0xbd   : > { %2030 = vsyncadd (%p2608_p0), [#allocation12], 4294966784  ;;  %p522_p5 = scmp.lt.s32.totalorder %s2049_s20, 1  ;;  %v2066_v0 = vmov 0.0   ;;  %vm2067_vm0 = vmmov 0   ;;  %v1785_v1 = vld [vmem:[#allocation11] sm:$0xff]  }
  0xbe   : > { %1589 = vmatprep.subr.bf16.mxu0 %v2066_v0  ;;  %1593 = vmatprep.mubr.msk.bf16.mxu0 %vm2067_vm0, %v2066_v0  ;;  %v1786_v2 = vld [vmem:[#allocation11 + $0x8] sm:$0xff]   ;;  %vm555_vm1 = vcmask 261120   ;;  %v1788_v4 = vld [vmem:[%s2565_s4] sm:$0xff]   ;;  %v1789_v5 = vld [vmem:[%s2565_s4 + $0x8] sm:$0xff]   ;;  %vm723_vm2 = vcmask 257024   ;;  %vm733_vm3 = vcmask 64512  }
  0xbf   : > { %s523_s25 = scalar_select %p522_p5, %s2049_s20, 1  ;;  %1597 = vmatprep.subr.bf16.mxu1 %v2066_v0  ;;  %1601 = vmatprep.mubr.msk.bf16.mxu1 %vm2067_vm0, %v2066_v0  ;;  %v661_v6 = vld [vmem:[%s2365_s26] sm:$0xf]  ;;  %v1791_v8 = vld [vmem:[#allocation13 + $0x8] sm:$0xff]   ;;  %vm780_vm4 = vcmask 130048   ;;  %vm1198_vm5 = vcmask 195584  }
  0xc0   : > { %1590 = vmatpush3.bf16.msra.mxu0 %v1785_v1  ;;  %v1790_v7 = vld [vmem:[#allocation13] sm:$0xff]   ;;  %s2068_s16 = smov 112   ;;  %s2069_s17 = smov 120   ;;  %v727_v41 = vld [vmem:[#allocation10] sm:$0xf] }
  0xc1   : > { %s1557_s30 = sshll.u32 %s523_s25, 3  ;;  %1591 = vmatprep.subr.bf16.mxu0 %v2066_v0  ;;  %1598 = vmatpush3.bf16.msra.mxu1 %v1790_v7  ;;  %s2070_s28 = smov 104   ;;  %v725_v40 = vld [vmem:[%s2372_s24] sm:$0xf]  ;;  %v728_v43 = vunpack.c.l.bf16 %v727_v41 }
  0xc2   : > { %s526_s11 = scalar_lea.vmem %s2562_s1, %s1557_s30  ;;  %1599 = vmatprep.subr.bf16.mxu1 %v2066_v0  ;;  %v726_v42 = vunpack.c.l.bf16 %v725_v40  ;;  %s2071_s25 = smov 8  }
  0xc3   : > { %v1787_v3 = vld [vmem:[%s526_s11] sm:$0xff]   ;;  %s2072_s3 = smov 16   ;;  %s2073_s11 = smov 24  }
  0xc4   : > { %1592 = vmatpush3.bf16.msra.mxu0 %v1786_v2  ;;  %v729_v44 = vadd.f32 %v728_v43, %v726_v42  ;;  %s2609_s21 = sld [smem:[#allocation27_spill]]  ;;  %s1520_s15 = sshll.u32 %s2361_s14, 3 }
  0xc5   : > { %1605 = vmatprep.subr.bf16.mxu0 %v2066_v0  ;;  %1600 = vmatpush3.bf16.msra.mxu1 %v1791_v8  ;;  %s1554_s5 = sshll.u32 %s2049_s20, 7  ;;  %s521_s29 = scalar_lea.vmem [#allocation14], %s1520_s15 }
  0xc6   : > { %1613 = vmatprep.subr.bf16.mxu1 %v2066_v0  ;;  %s1357_s12 = sshll.u32 %s521_s29, 4  ;;  %s2611_s24 = sld [smem:[#allocation29_spill]]  ;;  %s2513_s12 = int_to_ptr.vmem [resolvable:$true] %s1357_s12 }
  0xc7   : > { %1594 = vmatmul.mubr.msk.bf16.vlgmr.msra.gmra.mrb[0].mxu0 %vm555_vm1, %v1787_v3  ;;  %s1343_s20 = scalar_lea.sflag [#allocation7], %s2361_s14  ;;  %s1963_s30 = scalar_lea.vmem %s2513_s12, 128 }
  0xc8   : > { %1606 = vmatpush3.bf16.msra.mxu0 %v1788_v4  ;;  %1609 = vmatprep.mubr.msk.bf16.mxu0 %vm2067_vm0, %v2066_v0  ;;  %p1964_p10 = scmp.ne.s32.totalorder %s2513_s12, %s1963_s30  ;;  %p2612_p13 = scmp.ne.s32.totalorder %s2600_s13, 0 }
  0xc9   : > { %1607 = vmatprep.subr.bf16.mxu0 %v2066_v0  ;;  %1602 = vmatmul.mubr.msk.bf16.vlgmr.msra.gmra.mrb[0].mxu1 %vm555_vm1, %v1787_v3  ;;  %s2074_s23 = smov [#allocation14]  }
  0xca   : > { %1615 = vmatprep.mubr.msk.bf16.mxu1 %vm2067_vm0, %v2066_v0  ;;  %p1965_p9 = pnand %p1964_p10, %p2612_p13 }
  0xcc   : > { %1608 = vmatpush3.bf16.msra.mxu0 %v1789_v5  ;;  %p1966_p7 = pneg %p1965_p9 }
  0xcd   : > { %1619 = vmatprep.subr.bf16.mxu0 %v2066_v0 }
  0xcf   : > { %1610 = vmatmul.mubr.msk.bf16.vlgmr.msra.gmra.mrb[4].mxu0 %vm555_vm1, %v661_v6 }
  0xd0   : > { %1621 = vmatprep.mubr.msk.bf16.mxu0 %vm2067_vm0, %v2066_v0 }
 0x19a   : > { %v593_v9 = vpop.f32.mrb[0].mxu0 }
 0x19b   : > { %v1595_v10 = vpop.f32.mrb[1].mxu0 }
 0x19c   : > { %v596_v11 = vpop.f32.mrb[2].mxu0  ;;  %v650_v25 = vpop.f32.mrb[0].mxu1 }
 0x19d   : > { %v657_v12 = vpack.c.bf16 %v596_v11, %v593_v9  ;;  %v1596_v13 = vpop.f32.mrb[3].mxu0  ;;  %v1603_v26 = vpop.f32.mrb[1].mxu1 }
 0x19e   : > { %v653_v27 = vpop.f32.mrb[2].mxu1 }
 0x19f   : > { %658 = vst.msk [vmem:[#allocation3] sm:$0xff] %vm555_vm1, %v657_v12  ;;  %v659_v28 = vpack.c.bf16 %v653_v27, %v650_v25  ;;  %v1604_v29 = vpop.f32.mrb[3].mxu1 }
 0x1a1   : > { %660 = vst.msk [vmem:[#allocation4] sm:$0xff] %vm555_vm1, %v659_v28 }
 0x1a2   : > { %v716_v14 = vpop.f32.mrb[4].mxu0 }
 0x1a3   : > { %v722_v15 = vpack.c.bf16 %v716_v14, %v716_v14  ;;  %v1611_v16 = vpop.f32.mrb[5].mxu0 }
 0x1a4   : > { %v719_v17 = vpop.f32.mrb[6].mxu0 }
 0x1a5   : > { %724 = vst.msk [vmem:[#allocation2] sm:$0xf] %vm723_vm2, %v722_v15  ;;  %v1612_v18 = vpop.f32.mrb[7].mxu0 }
 0x1a6   : > { %v953_v19 = vld [vmem:[#allocation3] sm:$0xff] }
 0x1a7   : > { %961 = vrot.lane.b32.xlu1 %v953_v19, %s2068_s16  ;;  %845 = vrot.lane.b32.xlu0 %v953_v19, %s2069_s17  ;;  %v738_v20 = vsel %vm733_vm3, %v953_v19, 0 }
 0x1a8   : > { %1614 = vmatpush3.bf16.xpose.msra.mxu1 %v738_v20  ;;  %v2432_v30 = vld [vmem:[#allocation4] sm:$0xff] }
 0x1a9   : > { %1625 = vmatprep.subr.bf16.mxu1 %v2066_v0  ;;  %1620 = vmatpush3.bf16.msra.mxu0 %v2432_v30 }
 0x1aa   : > { %1631 = vmatprep.subr.bf16.mxu0 %v2066_v0 }
 0x1ac   : > { %v1792_v21 = vld [vmem:[#allocation2] ss:$0 sps:$4 sm:$0xff]  }
 0x1ad   : > { %v1793_v22 = vld [vmem:[#allocation2] ss:$0 sps:$4 sm:$0xff]   ;;  %958 = vrot.lane.b32.xlu1 %v1792_v21, %s2068_s16 }
 0x1ae   : > { %v730_v23 = vld [vmem:[#allocation2] sm:$0xf]  ;;  %842 = vrot.lane.b32.xlu0 %v1793_v22, %s2069_s17 }
 0x1af   : > { %1616 = vmatmul.mubr.msk.bf16.vlgmr.msra.gmra.mrb[4].mxu1 %vm733_vm3, %v730_v23  ;;  %v1794_v24 = vld [vmem:[#allocation2] ss:$0 sps:$4 sm:$0xff]  }
 0x1b0   : > { %1627 = vmatprep.mubr.msk.bf16.mxu1 %vm2067_vm0, %v2066_v0 }
 0x1b1   : > { %1074 = vrot.lane.b32.xlu1 %v1794_v24, %s2070_s28 }
 0x1b2   : > { %1077 = vrot.lane.b32.xlu0 %v953_v19, %s2070_s28 }
 0x219   : > { %v846_v31 = vpop.permute.xlu0 %845  ;;  %v962_v33 = vpop.permute.xlu1 %961 }
 0x21a   : > { %v851_v32 = vsel %vm733_vm3, %v846_v31, 0  ;;  %v967_v35 = vsel %vm733_vm3, %v962_v33, 0  ;;  %v1200_v33 = vld [vmem:[%s2365_s26] sm:$0xf] }
 0x21b   : > { %1626 = vmatpush3.bf16.xpose.msra.mxu1 %v851_v32  ;;  %v1795_v32 = vld [vmem:[%s2568_s7] sm:$0xff]  }
 0x21c   : > { %1637 = vmatprep.subr.bf16.mxu1 %v2066_v0 }
 0x21f   : > { %v959_v37 = vpop.permute.xlu1 %958 }
 0x220   : > { %v843_v34 = vpop.permute.xlu0 %842 }
 0x222   : > { %1628 = vmatmul.mubr.msk.bf16.vlgmr.msra.gmra.mrb[8].mxu1 %vm733_vm3, %v843_v34 }
 0x223   : > { %1638 = vmatpush3.bf16.xpose.msra.mxu1 %v967_v35  ;;  %1639 = vmatprep.mubr.msk.bf16.mxu1 %vm2067_vm0, %v2066_v0  ;;  %v1075_v39 = vpop.permute.xlu1 %1074 }
 0x224   : > { %1649 = vmatprep.subr.bf16.mxu1 %v2066_v0  ;;  %v1078_v36 = vpop.permute.xlu0 %1077 }
 0x225   : > { %v1083_v38 = vsel %vm733_vm3, %v1078_v36, 0 }
 0x22a   : > { %1640 = vmatmul.mubr.msk.bf16.vlgmr.msra.gmra.mrb[12].mxu1 %vm733_vm3, %v959_v37 }
 0x22b   : > { %1650 = vmatpush3.bf16.xpose.msra.mxu1 %v1083_v38  ;;  %1651 = vmatprep.mubr.msk.bf16.mxu1 %vm2067_vm0, %v2066_v0 }
 0x22c   : > { %1661 = vmatprep.subr.bf16.mxu1 %v2066_v0 }
 0x232   : > { %1652 = vmatmul.mubr.msk.bf16.vlgmr.msra.gmra.mrb[16].mxu1 %vm733_vm3, %v1075_v39 }
 0x233   : > { %1665 = vmatprep.mubr.msk.bf16.mxu1 %vm2067_vm0, %v2066_v0  ;;  %1662 = vmatpush3.bf16.msra.mxu1 %v1795_v32 }
 0x234   : > { %1663 = vmatprep.subr.bf16.mxu1 %v2066_v0 }
 0x282   : > { %v774_v45 = vpop.f32.mrb[4].mxu1 }
 0x283   : > { %v775_v46 = vadd.f32 %v774_v45, %v729_v44  ;;  %v1617_v47 = vpop.f32.mrb[5].mxu1 }
 0x284   : > { %v777_v48 = vpop.f32.mrb[6].mxu1 }
 0x285   : > { %v1618_v49 = vpop.f32.mrb[7].mxu1  ;;  %v781_v50 = vsel %vm780_vm4, %v775_v46, -inf }
 0x286   : > { %782 = vmax.xlane.f32.xlu0 %v781_v50 }
 0x2f5   : > { %v887_v51 = vpop.f32.mrb[8].mxu1 }
 0x2f6   : > { %v888_v52 = vadd.f32 %v887_v51, %v729_v44  ;;  %v1629_v53 = vpop.f32.mrb[9].mxu1 }
 0x2f7   : > { %v890_v54 = vpop.f32.mrb[10].mxu1 }
 0x2f8   : > { %v1630_v55 = vpop.f32.mrb[11].mxu1  ;;  %v893_v56 = vsel %vm780_vm4, %v888_v52, -inf }
 0x2f9   : > { %894 = vmax.xlane.f32.xlu1 %v893_v56  ;;  %v1797_v56 = vld [vmem:[%s2570_s9] sm:$0xff]  }
 0x2fd   : > { %v1003_v57 = vpop.f32.mrb[12].mxu1 }
 0x2fe   : > { %v1004_v58 = vadd.f32 %v1003_v57, %v729_v44  ;;  %v1641_v59 = vpop.f32.mrb[13].mxu1 }
 0x2ff   : > { %v1006_v60 = vpop.f32.mrb[14].mxu1 }
 0x300   : > { %v1642_v61 = vpop.f32.mrb[15].mxu1  ;;  %v1009_v62 = vsel %vm780_vm4, %v1004_v58, -inf }
 0x301   : > { %1010 = vmax.xlane.f32.xlu0 %v1009_v62  ;;  %v1798_v61 = vld [vmem:[%s2570_s9 + $0x8] sm:$0xff]  }
 0x305   : > { %v1119_v63 = vpop.f32.mrb[16].mxu1 }
 0x306   : > { %v1120_v1 = vadd.f32 %v1119_v63, %v729_v44  ;;  %v1653_v2 = vpop.f32.mrb[17].mxu1 }
 0x307   : > { %v1122_v3 = vpop.f32.mrb[18].mxu1 }
 0x308   : > { %v1654_v4 = vpop.f32.mrb[19].mxu1  ;;  %v1125_v5 = vsel %vm780_vm4, %v1120_v1, -inf }
 0x309   : > { %1126 = vmax.xlane.f32.xlu0 %v1125_v5 }
 0x313   : > { %v783_v6 = vpop.xlane.xlu0 %782 }
 0x314   : > { %v784_v7 = vsub.f32 %v775_v46, %v783_v6  ;;  %v1544_v6 = vld [vmem:[%s2609_s21] ss:$0 sm:$0xff] }
 0x316   : > { %v785_v8 = vmul.f32 1.442695, %v784_v7 }
 0x318   : > { %1799 = vpow2.f32 %v785_v8 }
 0x322   : > { %v1800_v9 = vpop.eup %1799 }
 0x323   : > { %v787_v10 = vsel %vm780_vm4, %v1800_v9, 0.0 }
 0x324   : > { %788 = vadd.xlane.f32.xlu1 %v787_v10 }
 0x335   : > { %906 = vrot.lane.b32.xlu1 %v2432_v30, %s2069_s17 }
 0x386   : > { %v895_v11 = vpop.xlane.xlu1 %894 }
 0x387   : > { %v896_v12 = vsub.f32 %v888_v52, %v895_v11 }
 0x389   : > { %v897_v13 = vmul.f32 1.442695, %v896_v12 }
 0x38b   : > { %1801 = vpow2.f32 %v897_v13 }
 0x38e   : > { %v1011_v14 = vpop.xlane.xlu0 %1010 }
 0x38f   : > { %v1012_v15 = vsub.f32 %v1004_v58, %v1011_v14 }
 0x391   : > { %v1013_v16 = vmul.f32 1.442695, %v1012_v15 }
 0x393   : > { %1803 = vpow2.f32 %v1013_v16 }
 0x395   : > { %v1802_v17 = vpop.eup %1801 }
 0x396   : > { %v1127_v18 = vpop.xlane.xlu0 %1126  ;;  %v899_v19 = vsel %vm780_vm4, %v1802_v17, 0.0 }
 0x397   : > { %v1128_v20 = vsub.f32 %v1120_v1, %v1127_v18  ;;  %900 = vadd.xlane.f32.xlu0 %v899_v19 }
 0x399   : > { %v1129_v21 = vmul.f32 1.442695, %v1128_v20 }
 0x39b   : > { %1805 = vpow2.f32 %v1129_v21 }
 0x39d   : > { %v1804_v22 = vpop.eup %1803 }
 0x39e   : > { %v1015_v23 = vsel %vm780_vm4, %v1804_v22, 0.0 }
 0x39f   : > { %1016 = vadd.xlane.f32.xlu1 %v1015_v23 }
 0x3a5   : > { %v1806_v24 = vpop.eup %1805 }
 0x3a6   : > { %v1131_v25 = vsel %vm780_vm4, %v1806_v24, 0.0 }
 0x3a7   : > { %1132 = vadd.xlane.f32.xlu0 %v1131_v25 }
 0x3b0   : > { %1138 = vrot.lane.b32.xlu1 %v2432_v30, %s2070_s28  ;;  %s2610_s28 = sld [smem:[#allocation28_spill]] }
 0x3b1   : > { %v789_v26 = vpop.xlane.xlu1 %788 }
 0x3b2   : > { %1807 = vrcp.f32 %v789_v26 }
 0x3b5   : > { %v907_v31 = vpop.permute.xlu1 %906 }
 0x3b6   : > { %v1549_v20 = vld [vmem:[%s2610_s28] ss:$0 sm:$0xff] }
 0x3bc   : > { %v1808_v27 = vpop.eup %1807 }
 0x3bd   : > { %v791_v28 = vmul.f32 %v1808_v27, %v1800_v9  ;;  %1022 = vrot.lane.b32.xlu0 %v2432_v30, %s2068_s16  ;;  %v1796_v30 = vld [vmem:[%s2568_s7 + $0x8] sm:$0xff]  }
 0x3be   : > { %1664 = vmatpush3.bf16.msra.mxu1 %v1796_v30 }
 0x3bf   : > { %v792_v29 = vpack.c.bf16 %v791_v28, %v791_v28 }
 0x3c1   : > { %1622 = vmatmul.mubr.msk.bf16.vlgmr.msra.gmra.mrb[8].mxu0 %vm780_vm4, %v792_v29  ;;  %1666 = vmatmul.mubr.msk.bf16.vlgmr.msra.gmra.mrb[20].mxu1 %vm555_vm1, %v1200_v33 }
 0x3c2   : > { %1632 = vmatpush3.bf16.msra.mxu0 %v907_v31  ;;  %1633 = vmatprep.mubr.msk.bf16.mxu0 %vm2067_vm0, %v2066_v0 }
 0x3c3   : > { %1643 = vmatprep.subr.bf16.mxu0 %v2066_v0 }
 0x424   : > { %v901_v34 = vpop.xlane.xlu0 %900 }
 0x425   : > { %1809 = vrcp.f32 %v901_v34 }
 0x42c   : > { %v1017_v35 = vpop.xlane.xlu1 %1016 }
 0x42d   : > { %1811 = vrcp.f32 %v1017_v35 }
 0x42f   : > { %v1810_v36 = vpop.eup %1809 }
 0x430   : > { %v903_v37 = vmul.f32 %v1810_v36, %v1802_v17  ;;  %v1139_v44 = vpop.permute.xlu1 %1138 }
 0x432   : > { %v904_v38 = vpack.c.bf16 %v903_v37, %v903_v37 }
 0x434   : > { %1634 = vmatmul.mubr.msk.bf16.vlgmr.msra.gmra.mrb[12].mxu0 %vm780_vm4, %v904_v38  ;;  %v1133_v39 = vpop.xlane.xlu0 %1132 }
 0x435   : > { %1813 = vrcp.f32 %v1133_v39  ;;  %1645 = vmatprep.mubr.msk.bf16.mxu0 %vm2067_vm0, %v2066_v0 }
 0x437   : > { %v1812_v40 = vpop.eup %1811 }
 0x438   : > { %v1019_v41 = vmul.f32 %v1812_v40, %v1804_v22  ;;  %v1023_v42 = vpop.permute.xlu0 %1022 }
 0x439   : > { %1644 = vmatpush3.bf16.msra.mxu0 %v1023_v42 }
 0x43a   : > { %v1020_v43 = vpack.c.bf16 %v1019_v41, %v1019_v41  ;;  %1655 = vmatprep.subr.bf16.mxu0 %v2066_v0 }
 0x43c   : > { %1646 = vmatmul.mubr.msk.bf16.vlgmr.msra.gmra.mrb[16].mxu0 %vm780_vm4, %v1020_v43 }
 0x43d   : > { %1656 = vmatpush3.bf16.msra.mxu0 %v1139_v44  ;;  %1657 = vmatprep.mubr.msk.bf16.mxu0 %vm2067_vm0, %v2066_v0 }
 0x43e   : > { %1669 = vmatprep.subr.bf16.mxu0 %v2066_v0 }
 0x43f   : > { %v1814_v45 = vpop.eup %1813 }
 0x440   : > { %v1135_v46 = vmul.f32 %v1814_v45, %v1806_v24 }
 0x442   : > { %v1136_v47 = vpack.c.bf16 %v1135_v46, %v1135_v46 }
 0x444   : > { %1658 = vmatmul.mubr.msk.bf16.vlgmr.msra.gmra.mrb[20].mxu0 %vm780_vm4, %v1136_v47 }
 0x445   : > { %1673 = vmatprep.mubr.msk.bf16.mxu0 %vm2067_vm0, %v2066_v0  ;;  %1670 = vmatpush3.bf16.msra.mxu0 %v1797_v56 }
 0x446   : > { %1671 = vmatprep.subr.bf16.mxu0 %v2066_v0 }
 0x449   : > { %1672 = vmatpush3.bf16.msra.mxu0 %v1798_v61 }
 0x494   : > { %v830_v48 = vpop.f32.mrb[8].mxu0  ;;  %v1261_v52 = vpop.f32.mrb[20].mxu1 }
 0x495   : > { %v1623_v49 = vpop.f32.mrb[9].mxu0  ;;  %v1667_v53 = vpop.f32.mrb[21].mxu1  ;;  %v1262_v7 = vadd.f32 %v1544_v6, %v1261_v52 }
 0x496   : > { %v833_v50 = vpop.f32.mrb[10].mxu0  ;;  %v1264_v54 = vpop.f32.mrb[22].mxu1 }
 0x497   : > { %v1624_v51 = vpop.f32.mrb[11].mxu0  ;;  %v1668_v55 = vpop.f32.mrb[23].mxu1  ;;  %v1548_v8 = vmul.f32 -1.442695, %v1262_v7 }
 0x499   : > { %1815 = vpow2.f32 %v1548_v8 }
 0x4a3   : > { %v1816_v9 = vpop.eup %1815 }
 0x4a4   : > { %v1270_v10 = vadd.f32 1.0, %v1816_v9 }
 0x4a6   : > { %1817 = vrcp.f32 %v1270_v10 }
 0x4b0   : > { %v1818_v13 = vpop.eup %1817 }
 0x507   : > { %v946_v57 = vpop.f32.mrb[12].mxu0 }
 0x508   : > { %1185 = vrot.lane.b32.xlu1 %v946_v57, %s2071_s25  ;;  %v1635_v58 = vpop.f32.mrb[13].mxu0  ;;  %s2511_s25 = scalar_lea.hbm %s2611_s24, %s1554_s5 }
 0x509   : > { %v949_v59 = vpop.f32.mrb[14].mxu0 }
 0x50a   : > { %v1636_v60 = vpop.f32.mrb[15].mxu0 }
 0x50f   : > { %v1062_v62 = vpop.f32.mrb[16].mxu0 }
 0x510   : > { %1189 = vrot.lane.b32.xlu0 %v1062_v62, %s2072_s3  ;;  %v1647_v63 = vpop.f32.mrb[17].mxu0  ;;  %s1967_s3 = sshll.u32 %s2074_s23, 4  ;;  %s1968_s3 = int_to_ptr.vmem [resolvable:$false] %s1967_s3 }
 0x511   : > { %v1065_v1 = vpop.f32.mrb[18].mxu0  ;;  %p1970_p12 = scmp.lt.s32.totalorder %s2513_s12, %s1968_s3 }
 0x512   : > { %v1648_v2 = vpop.f32.mrb[19].mxu0 }
 0x517   : > { %v1178_v3 = vpop.f32.mrb[20].mxu0 }
 0x518   : > { %1193 = vrot.lane.b32.xlu1 %v1178_v3, %s2073_s11  ;;  %v1659_v0 = vpop.f32.mrb[21].mxu0  ;;  %s1969_s11 = scalar_lea.vmem %s1968_s3, 256 }
 0x519   : > { %v1181_v4 = vpop.f32.mrb[22].mxu0  ;;  %p1971_p4 = scmp.lt.s32.totalorder %s1969_s11, %s1963_s30 }
 0x51a   : > { %v1660_v5 = vpop.f32.mrb[23].mxu0 }
 0x51b   : > { %p1972_p6 = por %p1971_p4, %p1970_p12 }
 0x51d   : > { %p1973_p2 = pnand %p1972_p6, %p1966_p7 }
 0x57a   : > { %v1186_v11 = vpop.permute.xlu1 %1185 }
 0x57b   : > { %v1196_v14 = vsel %vm733_vm3, %v830_v48, %v1186_v11 }
 0x582   : > { %v1190_v12 = vpop.permute.xlu0 %1189 }
 0x583   : > { %v1197_v15 = vsel %vm780_vm4, %v1196_v14, %v1190_v12 }
 0x58a   : > { %v1194_v16 = vpop.permute.xlu1 %1193 }
 0x58b   : > { %v1199_v17 = vsel %vm1198_vm5, %v1197_v15, %v1194_v16 }
 0x58c   : > { %v1273_v18 = vmul.f32 %v1818_v13, %v1199_v17 }
 0x58e   : > { %v1274_v19 = vpack.c.bf16 %v1273_v18, %v1273_v18 }
 0x590   : > { %1674 = vmatmul.mubr.msk.bf16.vlgmr.msra.gmra.mrb[24].mxu0 %vm555_vm1, %v1274_v19 }
 0x663   : > { %v1335_v21 = vpop.f32.mrb[24].mxu0 }
 0x664   : > { %v1336_v22 = vadd.f32 %v1549_v20, %v1335_v21  ;;  %v1675_v23 = vpop.f32.mrb[25].mxu0 }
 0x665   : > { %v1338_v24 = vpop.f32.mrb[26].mxu0 }
 0x666   : > { %v1676_v25 = vpop.f32.mrb[27].mxu0  ;;  %1341 = vst.msk [vmem:[%s521_s29] sm:$0xff] %vm780_vm4, %v1336_v22 }
 0x667   : > { %1976 = shalt.err (!%p1973_p2)
}
 0x668   : > { %s1977_s14 = scalar_lea.hbm %s2511_s25, 128  ;;  %s1981_s21 = scalar_lea.hbm %s2611_s24, 256 }
 0x669   : > { %p1978_p1 = scmp.ne.s32.totalorder %s2511_s25, %s1977_s14  ;;  %p1982_p11 = scmp.lt.u32.totalorder %s2511_s25, %s2611_s24 }
 0x66a   : > { %p1983_p0 = scmp.lt.u32.totalorder %s1981_s21, %s1977_s14  ;;  %p1985_p10 = scmp.lt.u32.totalorder %s1977_s14, %s2511_s25 }
 0x66b   : > { %p1979_p8 = pnand %p1978_p1, %p2612_p13 }
 0x66c   : > { %p1984_p5 = por %p1983_p0, %p1982_p11 }
 0x66d   : > { %p1980_p3 = pneg %p1979_p8 }
 0x66e   : > { %p1986_p9 = por %p1985_p10, %p1984_p5 }
 0x670   : > { %p1987_p7 = pnand %p1986_p9, %p1980_p3 }
 0x672   : > { %1990 = shalt.err (!%p1987_p7)
}
 0x673   : > { %1693 = dma.vmem_to_hbm [thread:$0]  (%p2612_p13), %s2513_s12, 128, %s2511_s25, %s1343_s20  }
 0x674 PF: > { %s2613_s17 = sld [smem:[#allocation20_spill]]  ;;  %s2614_s28 = sld [smem:[#allocation22_spill]] }
 0x675   : > { %p2616_p4 = scmp.ge.s32.totalorder %s2057_s22, 2 }
 0x67a   : > { %s1369_s5 = sand.u32 1, %s2613_s17   ;;  %p2615_p12 = scmp.ne.s32.totalorder %s2614_s28, 0 }
 0x67b   : > { %s1370_s29 = scalar_lea.sflag [#allocation7], %s1369_s5 }
 0x67c   : > { %p1713_p6 = pnand %p2616_p4, %p2615_p12 }
 0x67e   : > { %2032 = dma.done.wait (!%p1713_p6), %s1370_s29, 128  }
 0x67f   : > { %2034 = vsyncadd (!%p1713_p6), %s1370_s29, 4294967168  ;;  %s31_s22 = sadd.s32 1, %s2057_s22   ;;  %s2617_s20 = sld [smem:[#allocation21_spill]] }
 0x680   : > { %p28_p2 = scmp.ge.s32.totalorder %s31_s22, 4   ;;  %s2618_s21 = sld [smem:[#allocation23_spill]] }
 0x681   : > { %s2619_s17 = smov %s2041_s18  ;;  %s2620_s18 = smov %s2045_s19 }
 0x682   : > { %s2621_s19 = smov %s2289_s8  ;;  %30 = sbr.rel (!%p28_p2) target bundleno = 16 (0x10), region = 142 }
 0x689   :  { %1375 = vsyncpa [#allocation6], 1 }
 0x68a   :  { %1377 = vsyncpa [#allocation6 + $0x1], 1 }
 0x68b   :  { %1378 = vsyncpa [#allocation9], 1 }
 0x68c   :  { %1380 = vsyncpa [#allocation9 + $0x1], 1 }
 0x68d   :  { %1381 = vsyncpa [#allocation12], 1 }
 0x68e   :  { %1382 = vsyncpa [#allocation7], 1 }
 0x68f   :  { %1384 = vsyncpa [#allocation7 + $0x1], 1 }

</bundles_post_ra>
